<compile_context>
chip_gen: v5e
topology: v5e:2x2
jax: 0.10.0
libtpu: 0.0.40
codegen_flags: <defaults>
</compile_context>

<pallas_src>
import jax
import jax.numpy as jnp
from jax.experimental import pallas as pl
from jax.experimental.pallas import tpu as pltpu


def _pow_kernel(base_ref, exp_ref, out_ref):
    # Elementwise hot path: base ** exponent, computed in f32 (EUP exp/log).
    b = base_ref[...].astype(jnp.float32)
    e = exp_ref[...].astype(jnp.float32)
    out_ref[...] = jnp.power(b, e).astype(out_ref.dtype)


def _pow_positive_kernel(base_ref, exp_ref, out_ref):
    # Cheaper lowering when the caller guarantees base > 0.
    b = base_ref[...].astype(jnp.float32)
    e = exp_ref[...].astype(jnp.float32)
    out_ref[...] = jnp.exp(e * jnp.log(b)).astype(out_ref.dtype)


def power_operation(base: jax.Array, exponent: jax.Array, *,
                    lanes_pref: int = 1024, max_lanes: int = 4096,
                    tile_bytes: int = 2 * 1024 * 1024,
                    assume_positive_base: bool = False) -> jax.Array:
    """Elementwise torch.pow(base, exponent) equivalent via Pallas.

    Works for any shape: inputs are flattened into a lane-dense (rows, lanes)
    slab, processed with ~tile_bytes-per-operand blocks, and reshaped back.
    """
    assert base.shape == exponent.shape, "children must produce same-shaped batches"
    assert lanes_pref % 128 == 0 and max_lanes % 128 == 0

    # torch.pow applies type promotion across base and exponent.
    out_dtype = jnp.result_type(base.dtype, exponent.dtype)
    orig_shape = base.shape

    n = 1
    for d in orig_shape:
        n *= int(d)
    if n == 0:
        return jnp.zeros(orig_shape, out_dtype)

    flat_b = base.reshape(-1)
    flat_e = exponent.reshape(-1)

    if n % 128 == 0:
        # Copy-free path: pick the largest 128-multiple divisor of n (<= max_lanes).
        lanes = 128
        m = n // 128
        for k in range(max_lanes // 128, 0, -1):
            if m % k == 0:
                lanes = 128 * k
                break
        n_padded = n
    else:
        # Ragged tail: pad only up to the next lane multiple (< lanes extra elems).
        # TODO(synk): for hot ragged shapes, pass n via scalar prefetch and mask
        # the tail in-kernel to avoid this full-array concatenate + output slice.
        lanes = lanes_pref
        n_padded = pl.cdiv(n, lanes) * lanes
        pad = n_padded - n
        # pow(1, 1) = 1 in the (discarded) pad region — no NaN/inf.
        flat_b = jnp.concatenate([flat_b, jnp.ones((pad,), dtype=flat_b.dtype)])
        flat_e = jnp.concatenate([flat_e, jnp.ones((pad,), dtype=flat_e.dtype)])

    rows = n_padded // lanes
    b2 = flat_b.reshape(rows, lanes)
    e2 = flat_e.reshape(rows, lanes)

    itemsize = max(jnp.dtype(base.dtype).itemsize,
                   jnp.dtype(exponent.dtype).itemsize,
                   jnp.dtype(out_dtype).itemsize)

    # ~tile_bytes per operand per block, independent of dtype / lane width.
    block_rows = max(8, tile_bytes // (lanes * itemsize))
    # Guarantee >= 2 grid steps when possible so both v7x TCs participate.
    block_rows = min(block_rows, pl.cdiv(rows, 2))
    block_rows = max(8, (block_rows // 8) * 8)      # keep (8, 128) divisibility
    if block_rows > rows:
        block_rows = rows                            # full-extent block is legal
    grid_rows = pl.cdiv(rows, block_rows)            # partial last block is fine

    spec = pl.BlockSpec((block_rows, lanes), lambda i: (i, 0))

    # VMEM budget: 3 arrays (base, exp, out) x 2 pipeline buffers per block,
    # plus headroom — clamped to this generation's physical VMEM capacity.
    block_bytes = block_rows * lanes * itemsize
    try:
        vmem_cap = int(pltpu.get_tpu_info().vmem_capacity_bytes)
    except Exception:
        vmem_cap = 64 * 1024 * 1024                  # v7x floor
    vmem_limit_bytes = min(max(16 * 1024 * 1024, int(6 * block_bytes * 1.5)),
                           int(vmem_cap * 0.9))

    kernel = _pow_positive_kernel if assume_positive_base else _pow_kernel

    out2 = pl.pallas_call(
        kernel,
        out_shape=jax.ShapeDtypeStruct((rows, lanes), out_dtype),
        grid_spec=pl.GridSpec(
            grid=(grid_rows,),
            in_specs=[spec, spec],
            out_specs=spec,
        ),
        compiler_params=pltpu.CompilerParams(
            dimension_semantics=("parallel",),
            vmem_limit_bytes=vmem_limit_bytes,
        ),
    )(b2, e2)

    flat_out = out2.reshape(-1)
    if n_padded != n:
        flat_out = flat_out[:n]
    return flat_out.reshape(orig_shape)


if __name__ == "__main__":
    key = jax.random.PRNGKey(0)
    k_base, k_exp, k_base2, k_exp2 = jax.random.split(key, 4)

    # Small deterministic "child outputs": batch=8 samples, 256 features.
    B, D = 8, 256
    base = jax.random.uniform(k_base, (B, D), dtype=jnp.float32,
                              minval=0.1, maxval=3.0)
    exponent = jax.random.uniform(k_exp, (B, D), dtype=jnp.float32,
                                  minval=-2.0, maxval=2.0)

    out = jax.block_until_ready(power_operation(base, exponent))
    ref = jnp.power(base, exponent)
    assert out.shape == ref.shape and out.dtype == ref.dtype
    assert jnp.allclose(out, ref, rtol=1e-5, atol=1e-5)

    # Non-divisible / odd shape (ragged pad path).
    B2, D2 = 5, 100
    base2 = jax.random.uniform(k_base2, (B2, D2), dtype=jnp.float32,
                               minval=0.1, maxval=3.0)
    exponent2 = jax.random.uniform(k_exp2, (B2, D2), dtype=jnp.float32,
                                   minval=-2.0, maxval=2.0)
    out2 = jax.block_until_ready(power_operation(base2, exponent2))
    ref2 = jnp.power(base2, exponent2)
    assert out2.shape == ref2.shape and out2.dtype == ref2.dtype
    assert jnp.allclose(out2, ref2, rtol=1e-5, atol=1e-5)

    # Positive-base fast path (exp(e*log(b))) matches on this domain.
    out3 = jax.block_until_ready(
        power_operation(base, exponent, assume_positive_base=True))
    assert jnp.allclose(out3, ref, rtol=1e-5, atol=1e-5)

    print("KERNEL_OK")
</pallas_src>

<mosaic_0001>
module attributes {stable_mosaic.version = 11 : i64} {
  func.func @_pow_kernel(%arg0: i32, %arg1: memref<1x2048xf32, #tpu.memory_space<vmem>>, %arg2: memref<1x2048xf32, #tpu.memory_space<vmem>>, %arg3: memref<1x2048xf32, #tpu.memory_space<vmem>>) attributes {dimension_semantics = [#tpu.dimension_semantics<parallel>], iteration_bounds = array<i64: 1>, scalar_prefetch = 0 : i64, scratch_operands = 0 : i64, tpu.core_type = #tpu.core_type<tc>, window_params = [{transform_indices = @transform_0, window_bounds = array<i64: 1, 2048>}, {transform_indices = @transform_1, window_bounds = array<i64: 1, 2048>}, {transform_indices = @transform_2, window_bounds = array<i64: 1, 2048>}]} {
    %c0 = arith.constant 0 : index
    %c0_0 = arith.constant 0 : index
    %0 = vector.load %arg1[%c0, %c0_0] : memref<1x2048xf32, #tpu.memory_space<vmem>>, vector<1x2048xf32>
    %c0_1 = arith.constant 0 : index
    %c0_2 = arith.constant 0 : index
    %1 = vector.load %arg2[%c0_1, %c0_2] : memref<1x2048xf32, #tpu.memory_space<vmem>>, vector<1x2048xf32>
    %2 = math.powf %0, %1 : vector<1x2048xf32>
    %c0_3 = arith.constant 0 : index
    %c0_4 = arith.constant 0 : index
    %3 = vector.load %arg3[%c0_3, %c0_4] : memref<1x2048xf32, #tpu.memory_space<vmem>>, vector<1x2048xf32>
    tpu.vector_store %arg3[%c0_3, %c0_4], %2 {strides = array<i32>} : memref<1x2048xf32, #tpu.memory_space<vmem>>, vector<1x2048xf32>,
    return
  }
  func.func @transform_0(%arg0: i32) -> (i32, i32) {
    %c0_i32 = arith.constant 0 : i32
    %c0_i32_0 = arith.constant 0 : i32
    return %arg0, %c0_i32 : i32, i32
  }
  func.func @transform_1(%arg0: i32) -> (i32, i32) {
    %c0_i32 = arith.constant 0 : i32
    %c0_i32_0 = arith.constant 0 : i32
    return %arg0, %c0_i32 : i32, i32
  }
  func.func @transform_2(%arg0: i32) -> (i32, i32) {
    %c0_i32 = arith.constant 0 : i32
    %c0_i32_0 = arith.constant 0 : i32
    return %arg0, %c0_i32 : i32, i32
  }
}

</mosaic_0001>

<bundles_post_ra>
// kernel: tpu_custom_call.1
= control target key start
LH: loop header
LB: loop body
LE: loop exit
PB: predicated region body
PF: predicated region fallthrough
CT: control target
= control target key end

     0   :  { %7 = vsyncpa [#allocation3], 0  ;;  %s615_s0 = inlined_call_operand.hbm [shape: f32[1,2048], index: 0, kind: input, shape index: {}]   ;;  %s616_s1 = inlined_call_operand.hbm [shape: f32[1,2048], index: 1, kind: input, shape index: {}]   ;;  %s617_s2 = inlined_call_operand.hbm [shape: f32[1,2048], index: 2, kind: output, shape index: {}]  }
   0x1   :  { %8 = vsyncpa [#allocation6], 0 }
   0x2   :  { %9 = vsyncpa [#allocation4], 0  ;;  %s15_s11 = sshll.u32 %s615_s0, 4  ;;  %s355_s12 = smov [#allocation2]   ;;  %s16_s11 = int_to_ptr.hbm [resolvable:$true] %s15_s11 }
   0x3   :  { %s17_s13 = sshll.u32 %s355_s12, 4  ;;  %s26_s16 = sshll.u32 %s616_s1, 4  ;;  %s18_s13 = int_to_ptr.vmem [resolvable:$true] %s17_s13  ;;  %s27_s16 = int_to_ptr.hbm [resolvable:$true] %s26_s16 }
   0x4   :  { %20 = dma.hbm_to_vmem [thread:$0]  %s16_s11, 256, %s18_s13, [#allocation3]  }
   0x5   :  { %s356_s17 = smov [#allocation5]  }
   0x6   :  { %s28_s18 = sshll.u32 %s356_s17, 4  ;;  %s29_s18 = int_to_ptr.vmem [resolvable:$true] %s28_s18 }
   0x7   :  { %31 = dma.hbm_to_vmem [thread:$0]  %s27_s16, 256, %s29_s18, [#allocation6]  }
   0x8   :  { %349 = dma.done.wait [#allocation3], 256  }
   0x9   :  { %350 = vsyncadd [#allocation3], 4294967040 }
   0xa   :  { %351 = dma.done.wait [#allocation6], 256  }
   0xb   :  { %352 = vsyncadd [#allocation6], 4294967040  ;;  %v381_v0 = vld [vmem:[#allocation2] sm:$0xff]  ;;  %v383_v1 = vld [vmem:[#allocation2 + $0x8] sm:$0xff]  ;;  %s359_s0 = smov [#allocation7]   ;;  %s55_s21 = sshll.u32 %s617_s2, 4  ;;  %s56_s21 = int_to_ptr.hbm [resolvable:$true] %s55_s21 }
   0xc   :  { %v386_v2 = vand.u32 2147483647, %v381_v0  ;;  %v389_v3 = vand.u32 2147483647, %v383_v1  ;;  %v399_v20 = vld [vmem:[#allocation5] sm:$0xff]  ;;  %v419_v58 = vld [vmem:[#allocation5 + $0x8] sm:$0xff] }
   0xd   :  { %v408_v29 = vand.u32 2147483647, %v399_v20  ;;  %v119_v35 = vceil.f32 %v399_v20  ;;  %v120_v36 = vfloor.f32 %v399_v20  ;;  %vm118_vm2 = vcmp.lt.s32.totalorder %v399_v20, 0  ;;  %s53_s1 = sshll.u32 %s359_s0, 4  ;;  %s54_s1 = int_to_ptr.vmem [resolvable:$true] %s53_s1 }
   0xe   :  { %v72_v4 = vand.u32 8388607, %v386_v2  ;;  %v173_v5 = vand.u32 8388607, %v389_v3  ;;  %v68_v15 = vand.u32 2139095040, %v386_v2  ;;  %v169_v25 = vand.u32 2139095040, %v389_v3 }
   0xf   :  { %v126_v41 = vfloor.f32 %v408_v29  ;;  %v121_v47 = vsel %vm118_vm2, %v119_v35, %v120_v36  ;;  %vm618_vm3 = vcmp.eq.f32.partialorder %v408_v29, 2139095040  ;;  %vm105_vm6 = vcmp.lt.f32.partialorder %v386_v2, 0.0 }
  0x10   :  { %v73_v6 = vor.u32 8388608, %v72_v4  ;;  %v174_v7 = vor.u32 8388608, %v173_v5  ;;  %v69_v21 = vshrl.u32 %v68_v15, 23  ;;  %v170_v34 = vshrl.u32 %v169_v25, 23 }
  0x11   :  { %v127_v53 = vcvt.f32.s32 %v126_v41  ;;  %vm122_vm4 = vcmp.ne.f32.partialorder %v399_v20, %v121_v47  ;;  %vm106_vm7 = vweird.f32 %v386_v2  ;;  %vm104_vm10 = vcmp.eq.f32.partialorder %v386_v2, 0.0 }
  0x12   :  { %v75_v8 = vand.u32 8388607, %v73_v6  ;;  %v176_v9 = vand.u32 8388607, %v174_v7  ;;  %v165_v30 = vadd.s32 4294967169, %v69_v21  ;;  %v266_v48 = vadd.s32 4294967169, %v170_v34  ;;  %vm423_vm5 = vmor %vm122_vm4, %vm618_vm3 }
  0x13   :  { %v128_v4 = vand.u32 1, %v127_v53  ;;  %vm130_vm9 = vmneg %vm423_vm5  ;;  %vm219_vm11 = vcmp.lt.s32.totalorder %v419_v58, 0  ;;  %vm103_vm12 = vcmp.eq.f32.partialorder %v386_v2, 1.0  ;;  %vm619_vm13 = vcmp.lt.f32.partialorder %v381_v0, 0 }
  0x14   :  { %v76_v10 = vor.u32 1065353216, %v75_v8  ;;  %v393_v12 = vor.u32 1065353216, %v176_v9  ;;  %v80_v42 = vadd.s32 1, %v165_v30  ;;  %v181_v59 = vadd.s32 1, %v266_v48  ;;  %vm461_vm4 = vmand %vm619_vm13, %vm423_vm5 }
  0x15   :  { %v428_v8 = vand.u32 2147483647, %v419_v58  ;;  %vm435_vm8 = vcmp.eq.s32.totalorder %v128_v4, 1  ;;  %vm621_vm14 = vcmp.lt.f32.partialorder %v399_v20, 0  ;;  %vm124_vm15 = vcmp.lt.f32.partialorder %v408_v29, 1266679808 }
  0x16   :  { %vm77_vm0 = vcmp.ge.f32.partialorder %v76_v10, 1.4142135  ;;  %v78_v11 = vmul.f32 0.5, %v76_v10  ;;  %v179_v16 = vmul.f32 0.5, %v393_v12  ;;  %vm178_vm1 = vcmp.ge.f32.partialorder %v393_v12, 1.4142135 }
  0x17   :  { %v81_v54 = vsel %vm77_vm0, %v80_v42, %v165_v30  ;;  %vm137_vm2 = vcmp.gt.f32.partialorder %v386_v2, 1065353216  ;;  %v357_v36 = vmov 2139095040   ;;  %vm159_vm13 = vcmp.ne.f32.partialorder %v399_v20, %v399_v20 }
  0x18   :  { %v79_v13 = vsel %vm77_vm0, %v78_v11, %v76_v10  ;;  %v180_v22 = vsel %vm178_vm1, %v179_v16, %v393_v12  ;;  %v101_v63 = vcvt.s32.f32 %v81_v54  ;;  %v182_v10 = vsel %vm178_vm1, %v181_v59, %v266_v48  ;;  %vm131_vm0 = vmand %vm435_vm8, %vm130_vm9 }
  0x19   :  { %v166_v14 = vadd.f32 -1.0, %v79_v13  ;;  %v405_v26 = vadd.f32 -1.0, %v180_v22  ;;  %v227_v12 = vfloor.f32 %v428_v8  ;;  %v202_v21 = vcvt.s32.f32 %v182_v10 }
  0x1a   :  { %vm620_vm1 = vcmp.eq.f32.partialorder %v381_v0, 0  ;;  %vm207_vm8 = vweird.f32 %v389_v3  ;;  %vm206_vm9 = vcmp.lt.f32.partialorder %v389_v3, 0.0  ;;  %v358_v47 = vmov 0  }
  0x1b   :  { %v83_v17 = vmul.f32 %v166_v14, %v166_v14  ;;  %v184_v31 = vmul.f32 %v405_v26, %v405_v26  ;;  %vm477_vm5 = vmand %vm621_vm14, %vm620_vm1 }
  0x1d   :  { %v84_v18 = vmul.f32 0.12621109, %v83_v17  ;;  %v86_v19 = vmul.f32 -0.20706727, %v83_v17  ;;  %v185_v37 = vmul.f32 0.12621109, %v184_v31 }
  0x1e   :  { %v187_v38 = vmul.f32 -0.20706727, %v184_v31 }
  0x1f   :  { %v85_v23 = vadd.f32 0.21545328, %v84_v18  ;;  %v87_v24 = vadd.f32 -0.23896284, %v86_v19  ;;  %v186_v43 = vadd.f32 0.21545328, %v185_v37 }
  0x20   :  { %v188_v44 = vadd.f32 -0.23896284, %v187_v38  ;;  %v153_v37 = vsel %vm621_vm14, 0, %v357_v36 }
  0x21   :  { %v88_v27 = vmul.f32 %v85_v23, %v83_v17  ;;  %v90_v28 = vmul.f32 %v87_v24, %v83_v17  ;;  %v189_v49 = vmul.f32 %v186_v43, %v184_v31  ;;  %v154_v43 = vxor.u32 2147483648, %v153_v37 }
  0x22   :  { %v191_v50 = vmul.f32 %v188_v44, %v184_v31 }
  0x23   :  { %v89_v32 = vadd.f32 0.28795174, %v88_v27  ;;  %v91_v33 = vadd.f32 -0.3607037, %v90_v28  ;;  %v190_v55 = vadd.f32 0.28795174, %v189_v49 }
  0x24   :  { %v192_v56 = vadd.f32 -0.3607037, %v191_v50 }
  0x25   :  { %v92_v39 = vmul.f32 %v89_v32, %v83_v17  ;;  %v94_v40 = vmul.f32 %v91_v33, %v83_v17  ;;  %v193_v60 = vmul.f32 %v190_v55, %v184_v31 }
  0x26   :  { %v195_v61 = vmul.f32 %v192_v56, %v184_v31 }
  0x27   :  { %v93_v45 = vadd.f32 0.48090908, %v92_v39  ;;  %v95_v46 = vadd.f32 -0.72134733, %v94_v40  ;;  %v194_v6 = vadd.f32 0.48090908, %v193_v60 }
  0x28   :  { %v196_v7 = vadd.f32 -0.72134733, %v195_v61 }
  0x29   :  { %v96_v51 = vmul.f32 %v93_v45, %v83_v17  ;;  %v98_v52 = vmul.f32 %v166_v14, %v95_v46  ;;  %v197_v11 = vmul.f32 %v194_v6, %v184_v31  ;;  %v221_v17 = vfloor.f32 %v419_v58 }
  0x2a   :  { %v199_v13 = vmul.f32 %v405_v26, %v196_v7  ;;  %v228_v31 = vcvt.f32.s32 %v227_v12 }
  0x2b   :  { %v97_v57 = vadd.f32 1.442695, %v96_v51  ;;  %v198_v18 = vadd.f32 1.442695, %v197_v11 }
  0x2c   :  { %v229_v40 = vand.u32 1, %v228_v31 }
  0x2d   :  { %v99_v62 = vadd.f32 %v98_v52, %v97_v57  ;;  %v200_v23 = vadd.f32 %v199_v13, %v198_v18 }
  0x2f   :  { %v100_v9 = vmul.f32 %v166_v14, %v99_v62  ;;  %v220_v14 = vceil.f32 %v419_v58  ;;  %v201_v30 = vmul.f32 %v405_v26, %v200_v23 }
  0x31   :  { %v102_v15 = vadd.f32 %v101_v63, %v100_v9  ;;  %v222_v25 = vsel %vm219_vm11, %v220_v14, %v221_v17  ;;  %v203_v26 = vadd.f32 %v202_v21, %v201_v30 }
  0x32   :  { %vm223_vm11 = vcmp.ne.f32.partialorder %v419_v58, %v222_v25 }
  0x33   :  { %v107_v19 = vsel %vm106_vm7, %v386_v2, %v102_v15  ;;  %vm136_vm7 = vcmp.lt.s32.totalorder %v381_v0, 0  ;;  %v208_v39 = vsel %vm207_vm8, %v389_v3, %v203_v26 }
  0x34   :  { %v108_v22 = vsel %vm105_vm6, nan, %v107_v19  ;;  %vm467_vm6 = vmand %vm124_vm15, %vm131_vm0  ;;  %vm205_vm0 = vcmp.eq.f32.partialorder %v389_v3, 0.0  ;;  %v209_v41 = vsel %vm206_vm9, nan, %v208_v39  ;;  %vm623_vm15 = vcmp.eq.f32.partialorder %v383_v1, 0 }
  0x35   :  { %v109_v24 = vsel %vm104_vm10, -inf, %v108_v22  ;;  %vm622_vm10 = vcmp.eq.f32.partialorder %v428_v8, 2139095040  ;;  %vm498_vm3 = vmand %vm136_vm7, %vm467_vm6  ;;  %v210_v44 = vsel %vm205_vm0, -inf, %v209_v41  ;;  %vm644_vm9 = vcmp.eq.f32.partialorder %v389_v3, 1.0 }
  0x36   :  { %v110_v27 = vsel %vm103_vm12, 0.0, %v109_v24  ;;  %vm488_vm12 = vmxor %vm621_vm14, %vm137_vm2  ;;  %vm158_vm2 = vcmp.ne.f32.partialorder %v381_v0, %v381_v0  ;;  %vm624_vm14 = vcmp.lt.f32.partialorder %v419_v58, 0  ;;  %v211_v46 = vsel %vm644_vm9, 0.0, %v210_v44 }
  0x37   :  { %v111_v32 = vmul.f32 %v110_v27, %v399_v20  ;;  %vm509_vm1 = vmor %vm223_vm11, %vm622_vm10  ;;  %vm238_vm11 = vcmp.gt.f32.partialorder %v389_v3, 1065353216  ;;  %vm645_vm10 = vcmp.lt.f32.partialorder %v399_v20, 0  ;;  %v212_v49 = vmul.f32 %v211_v46, %v419_v58 }
  0x38   :  { %vm148_vm7 = vmor %vm477_vm5, %vm488_vm12  ;;  %v141_v48 = vsel %vm645_vm10, 2139095040, %v358_v47  ;;  %vm230_vm5 = vcmp.eq.s32.totalorder %v229_v40, 1  ;;  %vm625_vm0 = vcmp.lt.f32.partialorder %v383_v1, 0  ;;  %v155_v54 = vsel %vm467_vm6, %v154_v43, %v153_v37 }
  0x39   :  { %273 = vpow2.f32 %v111_v32  ;;  %vm519_vm8 = vmor %vm158_vm2, %vm159_vm13  ;;  %v149_v51 = vsel %vm148_vm7, 2139095040, %v358_v47  ;;  %vm150_vm13 = vcmp.eq.f32.partialorder %v381_v0, 3212836864  ;;  %v254_v56 = vsel %vm624_vm14, 0, %v357_v36 }
  0x3a   :  { %vm231_vm12 = vmneg %vm509_vm1  ;;  %275 = vpow2.f32 %v212_v49  ;;  %vm650_vm7 = vcmp.eq.f32.partialorder %v381_v0, 0  ;;  %vm225_vm9 = vcmp.lt.f32.partialorder %v428_v8, 1266679808  ;;  %vm135_vm6 = vcmp.eq.f32.partialorder %v381_v0, 1065353216 }
  0x3b   :  { %vm537_vm2 = vmand %vm624_vm14, %vm623_vm15  ;;  %v151_v60 = vsel %vm150_vm13, 1065353216, %v149_v51  ;;  %v255_v63 = vxor.u32 2147483648, %v254_v56 }
  0x3c   :  { %vm547_vm10 = vmxor %vm624_vm14, %vm238_vm11  ;;  %vm138_vm14 = vcmp.eq.f32.partialorder %v386_v2, 2139095040 }
  0x3d   :  { %vm232_vm15 = vmand %vm230_vm5, %vm231_vm12 }
  0x3e   :  { %vm562_vm11 = vmand %vm625_vm0, %vm509_vm1  ;;  %vm656_vm1 = vcmp.eq.f32.partialorder %v408_v29, 2139095040  ;;  %vm237_vm0 = vcmp.lt.s32.totalorder %v383_v1, 0 }
  0x3f   :  { %v274_v50 = vpop.eup %273  ;;  %vm249_vm5 = vmor %vm537_vm2, %vm547_vm10  ;;  %vm116_vm2 = vcmp.eq.f32.partialorder %v399_v20, 1065353216  ;;  %vm658_vm10 = vcmp.eq.f32.partialorder %v383_v1, 0 }
  0x40   :  { %v140_v53 = vsel %vm461_vm4, 2143289344, %v274_v50  ;;  %vm115_vm4 = vcmp.eq.f32.partialorder %v399_v20, 0  ;;  %vm575_vm12 = vmand %vm225_vm9, %vm232_vm15  ;;  %v276_v7 = vpop.eup %275  ;;  %v250_v10 = vsel %vm249_vm5, 2139095040, %v358_v47  ;;  %vm216_vm15 = vcmp.eq.f32.partialorder %v419_v58, 0 }
  0x41   :  { %v142_v57 = vsel %vm650_vm7, %v141_v48, %v140_v53  ;;  %vm653_vm7 = vcmp.lt.f32.partialorder %v381_v0, 0  ;;  %vm162_vm13 = vmor %vm135_vm6, %vm115_vm4  ;;  %v241_v29 = vsel %vm562_vm11, 2143289344, %v276_v7  ;;  %v256_v13 = vsel %vm575_vm12, %v255_v63, %v254_v56 }
  0x42   :  { %v144_v59 = vxor.u32 2147483648, %v142_v57  ;;  %v156_v62 = vsel %vm653_vm7, %v155_v54, %v153_v37  ;;  %vm657_vm7 = vcmp.lt.f32.partialorder %v419_v58, 0  ;;  %vm259_vm9 = vcmp.ne.f32.partialorder %v383_v1, %v383_v1 }
  0x43   :  { %v242_v2 = vsel %vm657_vm7, 2139095040, %v358_v47  ;;  %vm236_vm4 = vcmp.eq.f32.partialorder %v383_v1, 1065353216  ;;  %vm239_vm6 = vcmp.eq.f32.partialorder %v389_v3, 2139095040  ;;  %vm659_vm11 = vcmp.lt.f32.partialorder %v383_v1, 0 }
  0x44   :  { %v145_v4 = vsel %vm498_vm3, %v144_v59, %v142_v57  ;;  %vm251_vm3 = vcmp.eq.f32.partialorder %v383_v1, 3212836864  ;;  %v243_v16 = vsel %vm658_vm10, %v242_v2, %v241_v29  ;;  %v257_v18 = vsel %vm659_vm11, %v256_v13, %v254_v56 }
  0x45   :  { %v152_v6 = vsel %vm656_vm1, %v151_v60, %v145_v4  ;;  %v245_v14 = vxor.u32 2147483648, %v243_v16  ;;  %v252_v17 = vsel %vm251_vm3, 1065353216, %v250_v10  ;;  %vm660_vm5 = vcmp.eq.f32.partialorder %v428_v8, 2139095040 }
  0x46   :  { %v157_v9 = vsel %vm138_vm14, %v156_v62, %v152_v6  ;;  %vm244_vm14 = vmand %vm237_vm0, %vm575_vm12  ;;  %vm217_vm1 = vcmp.eq.f32.partialorder %v419_v58, 1065353216 }
  0x47   :  { %v161_v11 = vsel %vm519_vm8, 2143289344, %v157_v9  ;;  %vm260_vm8 = vcmp.ne.f32.partialorder %v419_v58, %v419_v58  ;;  %v246_v12 = vsel %vm244_vm14, %v245_v14, %v243_v16  ;;  %vm263_vm12 = vmor %vm236_vm4, %vm216_vm15 }
  0x48   :  { %v163_v15 = vsel %vm162_vm13, 1065353216, %v161_v11  ;;  %vm261_vm0 = vmor %vm259_vm9, %vm260_vm8  ;;  %v253_v19 = vsel %vm660_vm5, %v252_v17, %v246_v12 }
  0x49   :  { %v164_v20 = vsel %vm116_vm2, %v381_v0, %v163_v15  ;;  %v258_v0 = vsel %vm239_vm6, %v257_v18, %v253_v19 }
  0x4a   :  { %46 = vst [vmem:[#allocation7] sm:$0xff] %v164_v20  ;;  %v262_v3 = vsel %vm261_vm0, 2143289344, %v258_v0 }
  0x4b   :  { %v264_v21 = vsel %vm263_vm12, 1065353216, %v262_v3 }
  0x4c   :  { %v265_v22 = vsel %vm217_vm1, %v383_v1, %v264_v21 }
  0x4d   :  { %47 = vst [vmem:[#allocation7 + $0x8] sm:$0xff] %v265_v22 }
  0x4e   :  { %58 = dma.vmem_to_hbm [thread:$0]  %s54_s1, 256, %s56_s21, [#allocation4]  }
  0x4f   :  { %353 = dma.done.wait [#allocation4], 256  }
  0x50   :  { %354 = vsyncadd [#allocation4], 4294967040 }
  0x51   :  { %63 = vsyncpa [#allocation3], 1 }
  0x52   :  { %64 = vsyncpa [#allocation6], 1 }
  0x53   :  { %65 = vsyncpa [#allocation4], 1 }

</bundles_post_ra>
